<compile_context>
chip_gen: v7x
topology: tpu7x:2x2x1
jax: 0.10.0
libtpu: 0.0.40
codegen_flags: <defaults>
</compile_context>

<pallas_src>
import jax
import jax.numpy as jnp
from jax.experimental import pallas as pl
from jax.experimental.pallas import tpu as pltpu

LANE = 128


def _round_up(x, m):
    return ((x + m - 1) // m) * m


def _vmem_capacity_bytes():
    try:
        return int(pltpu.get_tpu_info().vmem_capacity_bytes)
    except Exception:
        return 128 * 1024 * 1024  # conservative default (v5e/v6e); v7x query normally succeeds


def prepare_params(params, *, matmul_dtype=jnp.float32):
    """One-time host-side padding/casting (hoisted out of the forward pass).

    params: list of (w, b) with w: (in, out), b: (1, out) or (out,).
    Returns (flat, meta): flat = [w0_p, b0_p, w1_p, b1_p, ...] with feature dims
    zero-padded to multiples of 128 lanes (exact through bias+ReLU), weights in
    matmul_dtype, biases in f32.
    """
    dims = [params[0][0].shape[0]] + [w.shape[1] for w, _ in params]
    pdims = tuple(_round_up(d, LANE) for d in dims)

    flat = []
    for li, (w, b) in enumerate(params):
        b2 = jnp.asarray(b).reshape(1, -1)
        w_p = (jnp.zeros((pdims[li], pdims[li + 1]), matmul_dtype)
               .at[: w.shape[0], : w.shape[1]].set(w.astype(matmul_dtype)))
        b_p = (jnp.zeros((1, pdims[li + 1]), jnp.float32)
               .at[:, : b2.shape[1]].set(b2.astype(jnp.float32)))
        flat.extend([w_p, b_p])

    meta = dict(pdims=pdims, in_dim=dims[0], out_dim=dims[-1],
                matmul_dtype=jnp.dtype(matmul_dtype))
    return flat, meta


def _mlp_kernel(x_ref, *refs):
    """Fused MLP forward for one batch tile.

    refs = (w0, b0, w1, b1, ..., wL, bL, out_ref). Weights (matmul dtype) and
    biases (f32) are VMEM-resident via constant index_maps; the x/out batch
    tiles are software-pipelined by the BlockSpec machinery.
    """
    out_ref = refs[-1]
    wb = refs[:-1]
    n_layers = len(wb) // 2
    mm_dtype = wb[0].dtype

    h = x_ref[...]
    if h.dtype != mm_dtype:
        h = h.astype(mm_dtype)                         # feed the MXU in the matmul dtype
    for i in range(n_layers):
        w = wb[2 * i][...]                             # (in_pad, out_pad), matmul dtype
        b = wb[2 * i + 1][...]                         # (1, out_pad), f32
        acc = jnp.dot(h, w, preferred_element_type=jnp.float32)   # MXU, f32 accumulation
        acc = jnp.maximum(acc + b, 0.0)                # bias + ReLU in f32 (incl. final layer)
        # Single down-cast per layer (no-op when matmul dtype is f32).
        h = acc if i == n_layers - 1 else acc.astype(mm_dtype)
    out_ref[...] = h.astype(out_ref.dtype)             # lane-dense (128-padded) store


def _fused_call(x_p, layer_arrays, tm, out_pad, out_dtype, *, vmem_budget, interpret):
    """Run the fused kernel on already-padded x and layers (any number of layers)."""
    padded_batch, in_pad = x_p.shape
    act_in_bytes = x_p.dtype.itemsize
    out_bytes = jnp.dtype(out_dtype).itemsize
    mm_bytes = layer_arrays[0].dtype.itemsize
    feat_dims = [in_pad] + [layer_arrays[2 * i].shape[1] for i in range(len(layer_arrays) // 2)]
    max_feat = max(feat_dims)
    w_bytes = sum(int(a.size) * a.dtype.itemsize for a in layer_arrays)

    def need(weight_bufs):
        n = 2 * tm * (in_pad * act_in_bytes + out_pad * out_bytes)   # double-buffered x/out tiles
        n += weight_bufs * w_bytes                                    # resident weights/biases
        n += tm * max_feat * (4 + mm_bytes)                           # f32 accumulator + activation copy
        return n

    def limit(n):
        if n <= 32 * 1024 * 1024:                                     # scoped default is enough
            return None
        return min(int(n * 3 // 2), vmem_budget)                      # clamped to the chip budget

    def build(single_buffer_weights):
        in_specs = [pl.BlockSpec((tm, in_pad), lambda i: (i, 0))]     # pipelined batch tile
        for a in layer_arrays:
            if single_buffer_weights:
                # Constant index_map => resident; single-buffered (no point double-buffering).
                in_specs.append(pl.BlockSpec(a.shape, lambda i: (0, 0),
                                             pipeline_mode=pl.Buffered(1)))
            else:
                in_specs.append(pl.BlockSpec(a.shape, lambda i: (0, 0)))
        out_spec = pl.BlockSpec((tm, out_pad), lambda i: (i, 0))
        bufs = 1 if single_buffer_weights else 2
        return pl.pallas_call(
            _mlp_kernel,
            out_shape=jax.ShapeDtypeStruct((padded_batch, out_pad), out_dtype),
            grid=(padded_batch // tm,),
            in_specs=in_specs,
            out_specs=out_spec,
            compiler_params=pltpu.CompilerParams(
                # Batch tiles are independent -> shard across TensorCores where supported.
                # TODO(synk): switch to pltpu.CORE_PARALLEL / explicit core_map on v7x once validated.
                dimension_semantics=("parallel",),
                vmem_limit_bytes=limit(need(bufs)),
            ),
            interpret=interpret,
        )

    try:
        return build(single_buffer_weights=True)(x_p, *layer_arrays)
    except Exception:
        # pipeline_mode=pl.Buffered(1) not supported on this jax version -> default buffering.
        return build(single_buffer_weights=False)(x_p, *layer_arrays)


def deeper_classifier_forward(x, flat, meta, *, tile_m=None, interpret=False):
    """x: (batch, in_features). flat/meta: output of prepare_params (one-time)."""
    batch, in_dim = x.shape
    compute_dtype = x.dtype
    act_bytes = jnp.dtype(compute_dtype).itemsize
    mm_bytes = meta["matmul_dtype"].itemsize
    pdims = meta["pdims"]
    in_pad, out_pad = pdims[0], pdims[-1]

    vmem_cap = _vmem_capacity_bytes()
    vmem_budget = int(0.85 * vmem_cap)                 # ~54 MiB on v7x, ~108 MiB on v5e/v6e

    # Bigger batch tiles amortize per-step overhead; v7x's 64 MiB VMEM caps the default at 256.
    if tile_m is None:
        tile_m = 256 if vmem_cap <= 64 * 1024 * 1024 else 512

    # Sublane pack of the narrowest on-chip dtype: 8 for f32, 16 for bf16, 32 for int8/fp8.
    sub = 8 * (4 // min(act_bytes, mm_bytes))

    # Tile selection: divide the batch tightly (avoid a ~2x-padded tail tile), and keep >= 2
    # grid steps when there is enough work so the batch axis can be split across cores.
    n_tiles = pl.cdiv(batch, tile_m)
    if n_tiles == 1 and batch >= 4 * sub:
        n_tiles = 2
    tm = _round_up(pl.cdiv(batch, n_tiles), sub)

    weight_bytes = sum(int(a.size) * a.dtype.itemsize for a in flat)
    max_feat = max(pdims)

    def fused_need(tm_):
        return (2 * tm_ * (in_pad + out_pad) * act_bytes   # double-buffered x/out tiles
                + weight_bytes                              # single-buffered resident weights
                + tm_ * max_feat * (4 + mm_bytes))          # f32 accumulator + activation copy

    # Decide between all-layers-resident (preferred) and per-layer weight streaming.
    all_resident = weight_bytes <= int(0.6 * vmem_budget)
    if all_resident:
        while fused_need(tm) > vmem_budget and tm > sub:
            tm = max(sub, _round_up(tm // 2, sub))
        all_resident = fused_need(tm) <= vmem_budget

    padded_batch = _round_up(batch, tm)
    x_p = (jnp.zeros((padded_batch, in_pad), compute_dtype)
           .at[:batch, :in_dim].set(x))

    if all_resident:
        out_padded = _fused_call(x_p, flat, tm, out_pad, compute_dtype,
                                 vmem_budget=vmem_budget, interpret=interpret)
    else:
        # Weight-streaming fallback: one layer per call, weights resident only for that layer.
        # TODO(synk): overlap next-layer weight DMA with compute via pltpu.emit_pipeline.
        n_layers = len(flat) // 2
        h = x_p
        for i in range(n_layers):
            out_dt = compute_dtype if i == n_layers - 1 else meta["matmul_dtype"]
            h = _fused_call(h, flat[2 * i: 2 * i + 2], tm, pdims[i + 1], out_dt,
                            vmem_budget=vmem_budget, interpret=interpret)
        out_padded = h

    return out_padded[:batch, :meta["out_dim"]]


def init_params(layer_list, class_num, key):
    """Mirror DeeperClassifier.__init__ layer construction, deterministic init."""
    dims = [(layer_list[i], layer_list[i + 1]) for i in range(len(layer_list) - 1)]
    # Quirky PyTorch indexing kept as-is: Linear(layerList[-1], layerList[classNum]).
    dims.append((layer_list[-1], layer_list[class_num]))

    params = []
    for (fan_in, fan_out) in dims:
        key, kw, kb = jax.random.split(key, 3)
        bound = 1.0 / jnp.sqrt(jnp.asarray(fan_in, jnp.float32))
        # Stored as (in, out) == transpose of PyTorch's (out, in).
        w = jax.random.uniform(kw, (fan_in, fan_out), jnp.float32, -bound, bound)
        b = jax.random.uniform(kb, (1, fan_out), jnp.float32, -bound, bound)
        params.append((w, b))
    return params


def reference_forward(x, params, matmul_dtype=jnp.float32):
    """Pure-JAX reference with the same per-layer cast points as the kernel."""
    h = x.astype(matmul_dtype)
    n = len(params)
    for idx, (w, b) in enumerate(params):
        acc = jnp.dot(h, w.astype(matmul_dtype), preferred_element_type=jnp.float32)
        acc = jnp.maximum(acc + b.reshape(1, -1).astype(jnp.float32), 0.0)
        h = acc if idx == n - 1 else acc.astype(matmul_dtype)
    return h.astype(x.dtype)


if __name__ == "__main__":
    key = jax.random.PRNGKey(0)

    layer_list = [32, 64, 48, 16]   # hidden sizes
    class_num = 2                   # final out_features = layer_list[2] = 48 (module's own indexing)
    batch = 8

    key, kx = jax.random.split(key)
    x = jax.random.normal(kx, (batch, layer_list[0]), jnp.float32)
    params = init_params(layer_list, class_num, key)

    # f32 path (matches PyTorch default precision). Padding/casting done ONCE here.
    flat_f32, meta_f32 = prepare_params(params, matmul_dtype=jnp.float32)
    out = jax.block_until_ready(deeper_classifier_forward(x, flat_f32, meta_f32))
    ref = reference_forward(x, params, matmul_dtype=jnp.float32)
    assert out.shape == (batch, layer_list[class_num])
    assert jnp.allclose(out, ref, atol=1e-4, rtol=1e-4)

    # bf16 path (MXU-friendly on v5e/v6e/v7x): bf16 matmul operands, f32 accumulation + bias/ReLU.
    flat_bf16, meta_bf16 = prepare_params(params, matmul_dtype=jnp.bfloat16)
    x_bf16 = x.astype(jnp.bfloat16)
    out_bf16 = jax.block_until_ready(deeper_classifier_forward(x_bf16, flat_bf16, meta_bf16))
    ref_bf16 = reference_forward(x_bf16, params, matmul_dtype=jnp.bfloat16)
    assert out_bf16.shape == (batch, layer_list[class_num])
    assert out_bf16.dtype == jnp.bfloat16
    assert jnp.allclose(out_bf16.astype(jnp.float32), ref_bf16.astype(jnp.float32),
                        atol=2e-2, rtol=2e-2)

    print("KERNEL_OK")
</pallas_src>

<mosaic_0001>
module attributes {stable_mosaic.version = 11 : i64} {
  func.func @_mlp_kernel(%arg0: i32, %arg1: memref<8x128xf32, #tpu.memory_space<vmem>>, %arg2: memref<128x128xf32, #tpu.memory_space<vmem>>, %arg3: memref<1x128xf32, #tpu.memory_space<vmem>>, %arg4: memref<128x128xf32, #tpu.memory_space<vmem>>, %arg5: memref<1x128xf32, #tpu.memory_space<vmem>>, %arg6: memref<128x128xf32, #tpu.memory_space<vmem>>, %arg7: memref<1x128xf32, #tpu.memory_space<vmem>>, %arg8: memref<128x128xf32, #tpu.memory_space<vmem>>, %arg9: memref<1x128xf32, #tpu.memory_space<vmem>>, %arg10: memref<8x128xf32, #tpu.memory_space<vmem>>) attributes {dimension_semantics = [#tpu.dimension_semantics<parallel>], iteration_bounds = array<i64: 1>, scalar_prefetch = 0 : i64, scratch_operands = 0 : i64, tpu.core_type = #tpu.core_type<tc>, window_params = [{transform_indices = @transform_0, window_bounds = array<i64: 8, 128>}, {pipeline_mode = #tpu.pipeline_mode<synchronous>, transform_indices = @transform_1, window_bounds = array<i64: 128, 128>}, {pipeline_mode = #tpu.pipeline_mode<synchronous>, transform_indices = @transform_2, window_bounds = array<i64: 1, 128>}, {pipeline_mode = #tpu.pipeline_mode<synchronous>, transform_indices = @transform_3, window_bounds = array<i64: 128, 128>}, {pipeline_mode = #tpu.pipeline_mode<synchronous>, transform_indices = @transform_4, window_bounds = array<i64: 1, 128>}, {pipeline_mode = #tpu.pipeline_mode<synchronous>, transform_indices = @transform_5, window_bounds = array<i64: 128, 128>}, {pipeline_mode = #tpu.pipeline_mode<synchronous>, transform_indices = @transform_6, window_bounds = array<i64: 1, 128>}, {pipeline_mode = #tpu.pipeline_mode<synchronous>, transform_indices = @transform_7, window_bounds = array<i64: 128, 128>}, {pipeline_mode = #tpu.pipeline_mode<synchronous>, transform_indices = @transform_8, window_bounds = array<i64: 1, 128>}, {transform_indices = @transform_9, window_bounds = array<i64: 8, 128>}]} {
    %c0 = arith.constant 0 : index
    %c0_0 = arith.constant 0 : index
    %0 = vector.load %arg1[%c0, %c0_0] : memref<8x128xf32, #tpu.memory_space<vmem>>, vector<8x128xf32>
    %c0_1 = arith.constant 0 : index
    %c0_2 = arith.constant 0 : index
    %1 = vector.load %arg2[%c0_1, %c0_2] : memref<128x128xf32, #tpu.memory_space<vmem>>, vector<128x128xf32>
    %c0_3 = arith.constant 0 : index
    %c0_4 = arith.constant 0 : index
    %2 = vector.load %arg3[%c0_3, %c0_4] : memref<1x128xf32, #tpu.memory_space<vmem>>, vector<1x128xf32>
    %cst = arith.constant dense<0.000000e+00> : vector<8x128xf32>
    %3 = tpu.matmul %0, %1, %cst {dimension_numbers = #tpu.dot_dimension_numbers<[1], [0], [0], [1], [0, 0, 1, 1], [], []>} : vector<8x128xf32>, vector<128x128xf32>, vector<8x128xf32> -> vector<8x128xf32>
    %4 = vector.broadcast %2 : vector<1x128xf32> to vector<8x128xf32>
    %5 = arith.addf %3, %4 : vector<8x128xf32>
    %cst_5 = arith.constant 0.000000e+00 : f32
    %6 = vector.broadcast %cst_5 : f32 to vector<8x128xf32>
    %7 = arith.maximumf %5, %6 : vector<8x128xf32>
    %c0_6 = arith.constant 0 : index
    %c0_7 = arith.constant 0 : index
    %8 = vector.load %arg4[%c0_6, %c0_7] : memref<128x128xf32, #tpu.memory_space<vmem>>, vector<128x128xf32>
    %c0_8 = arith.constant 0 : index
    %c0_9 = arith.constant 0 : index
    %9 = vector.load %arg5[%c0_8, %c0_9] : memref<1x128xf32, #tpu.memory_space<vmem>>, vector<1x128xf32>
    %cst_10 = arith.constant dense<0.000000e+00> : vector<8x128xf32>
    %10 = tpu.matmul %7, %8, %cst_10 {dimension_numbers = #tpu.dot_dimension_numbers<[1], [0], [0], [1], [0, 0, 1, 1], [], []>} : vector<8x128xf32>, vector<128x128xf32>, vector<8x128xf32> -> vector<8x128xf32>
    %11 = vector.broadcast %9 : vector<1x128xf32> to vector<8x128xf32>
    %12 = arith.addf %10, %11 : vector<8x128xf32>
    %cst_11 = arith.constant 0.000000e+00 : f32
    %13 = vector.broadcast %cst_11 : f32 to vector<8x128xf32>
    %14 = arith.maximumf %12, %13 : vector<8x128xf32>
    %c0_12 = arith.constant 0 : index
    %c0_13 = arith.constant 0 : index
    %15 = vector.load %arg6[%c0_12, %c0_13] : memref<128x128xf32, #tpu.memory_space<vmem>>, vector<128x128xf32>
    %c0_14 = arith.constant 0 : index
    %c0_15 = arith.constant 0 : index
    %16 = vector.load %arg7[%c0_14, %c0_15] : memref<1x128xf32, #tpu.memory_space<vmem>>, vector<1x128xf32>
    %cst_16 = arith.constant dense<0.000000e+00> : vector<8x128xf32>
    %17 = tpu.matmul %14, %15, %cst_16 {dimension_numbers = #tpu.dot_dimension_numbers<[1], [0], [0], [1], [0, 0, 1, 1], [], []>} : vector<8x128xf32>, vector<128x128xf32>, vector<8x128xf32> -> vector<8x128xf32>
    %18 = vector.broadcast %16 : vector<1x128xf32> to vector<8x128xf32>
    %19 = arith.addf %17, %18 : vector<8x128xf32>
    %cst_17 = arith.constant 0.000000e+00 : f32
    %20 = vector.broadcast %cst_17 : f32 to vector<8x128xf32>
    %21 = arith.maximumf %19, %20 : vector<8x128xf32>
    %c0_18 = arith.constant 0 : index
    %c0_19 = arith.constant 0 : index
    %22 = vector.load %arg8[%c0_18, %c0_19] : memref<128x128xf32, #tpu.memory_space<vmem>>, vector<128x128xf32>
    %c0_20 = arith.constant 0 : index
    %c0_21 = arith.constant 0 : index
    %23 = vector.load %arg9[%c0_20, %c0_21] : memref<1x128xf32, #tpu.memory_space<vmem>>, vector<1x128xf32>
    %cst_22 = arith.constant dense<0.000000e+00> : vector<8x128xf32>
    %24 = tpu.matmul %21, %22, %cst_22 {dimension_numbers = #tpu.dot_dimension_numbers<[1], [0], [0], [1], [0, 0, 1, 1], [], []>} : vector<8x128xf32>, vector<128x128xf32>, vector<8x128xf32> -> vector<8x128xf32>
    %25 = vector.broadcast %23 : vector<1x128xf32> to vector<8x128xf32>
    %26 = arith.addf %24, %25 : vector<8x128xf32>
    %cst_23 = arith.constant 0.000000e+00 : f32
    %27 = vector.broadcast %cst_23 : f32 to vector<8x128xf32>
    %28 = arith.maximumf %26, %27 : vector<8x128xf32>
    %c0_24 = arith.constant 0 : index
    %c0_25 = arith.constant 0 : index
    %29 = vector.load %arg10[%c0_24, %c0_25] : memref<8x128xf32, #tpu.memory_space<vmem>>, vector<8x128xf32>
    tpu.vector_store %arg10[%c0_24, %c0_25], %28 {strides = array<i32>} : memref<8x128xf32, #tpu.memory_space<vmem>>, vector<8x128xf32>,
    return
  }
  func.func @transform_0(%arg0: i32) -> (i32, i32) {
    %c0_i32 = arith.constant 0 : i32
    %c0_i32_0 = arith.constant 0 : i32
    return %arg0, %c0_i32 : i32, i32
  }
  func.func @transform_1(%arg0: i32) -> (i32, i32) {
    %c0_i32 = arith.constant 0 : i32
    %c0_i32_0 = arith.constant 0 : i32
    %c0_i32_1 = arith.constant 0 : i32
    return %c0_i32, %c0_i32_0 : i32, i32
  }
  func.func @transform_2(%arg0: i32) -> (i32, i32) {
    %c0_i32 = arith.constant 0 : i32
    %c0_i32_0 = arith.constant 0 : i32
    %c0_i32_1 = arith.constant 0 : i32
    return %c0_i32, %c0_i32_0 : i32, i32
  }
  func.func @transform_3(%arg0: i32) -> (i32, i32) {
    %c0_i32 = arith.constant 0 : i32
    %c0_i32_0 = arith.constant 0 : i32
    %c0_i32_1 = arith.constant 0 : i32
    return %c0_i32, %c0_i32_0 : i32, i32
  }
  func.func @transform_4(%arg0: i32) -> (i32, i32) {
    %c0_i32 = arith.constant 0 : i32
    %c0_i32_0 = arith.constant 0 : i32
    %c0_i32_1 = arith.constant 0 : i32
    return %c0_i32, %c0_i32_0 : i32, i32
  }
  func.func @transform_5(%arg0: i32) -> (i32, i32) {
    %c0_i32 = arith.constant 0 : i32
    %c0_i32_0 = arith.constant 0 : i32
    %c0_i32_1 = arith.constant 0 : i32
    return %c0_i32, %c0_i32_0 : i32, i32
  }
  func.func @transform_6(%arg0: i32) -> (i32, i32) {
    %c0_i32 = arith.constant 0 : i32
    %c0_i32_0 = arith.constant 0 : i32
    %c0_i32_1 = arith.constant 0 : i32
    return %c0_i32, %c0_i32_0 : i32, i32
  }
  func.func @transform_7(%arg0: i32) -> (i32, i32) {
    %c0_i32 = arith.constant 0 : i32
    %c0_i32_0 = arith.constant 0 : i32
    %c0_i32_1 = arith.constant 0 : i32
    return %c0_i32, %c0_i32_0 : i32, i32
  }
  func.func @transform_8(%arg0: i32) -> (i32, i32) {
    %c0_i32 = arith.constant 0 : i32
    %c0_i32_0 = arith.constant 0 : i32
    %c0_i32_1 = arith.constant 0 : i32
    return %c0_i32, %c0_i32_0 : i32, i32
  }
  func.func @transform_9(%arg0: i32) -> (i32, i32) {
    %c0_i32 = arith.constant 0 : i32
    %c0_i32_0 = arith.constant 0 : i32
    return %arg0, %c0_i32 : i32, i32
  }
}

module attributes {stable_mosaic.version = 11 : i64} {
  func.func @_mlp_kernel(%arg0: i32, %arg1: memref<8x128xf32, #tpu.memory_space<vmem>>, %arg2: memref<128x128xf32, #tpu.memory_space<vmem>>, %arg3: memref<1x128xf32, #tpu.memory_space<vmem>>, %arg4: memref<128x128xf32, #tpu.memory_space<vmem>>, %arg5: memref<1x128xf32, #tpu.memory_space<vmem>>, %arg6: memref<128x128xf32, #tpu.memory_space<vmem>>, %arg7: memref<1x128xf32, #tpu.memory_space<vmem>>, %arg8: memref<128x128xf32, #tpu.memory_space<vmem>>, %arg9: memref<1x128xf32, #tpu.memory_space<vmem>>, %arg10: memref<8x128xf32, #tpu.memory_space<vmem>>) attributes {dimension_semantics = [#tpu.dimension_semantics<parallel>], iteration_bounds = array<i64: 1>, scalar_prefetch = 0 : i64, scratch_operands = 0 : i64, tpu.core_type = #tpu.core_type<tc>, window_params = [{transform_indices = @transform_0, window_bounds = array<i64: 8, 128>}, {pipeline_mode = #tpu.pipeline_mode<synchronous>, transform_indices = @transform_1, window_bounds = array<i64: 128, 128>}, {pipeline_mode = #tpu.pipeline_mode<synchronous>, transform_indices = @transform_2, window_bounds = array<i64: 1, 128>}, {pipeline_mode = #tpu.pipeline_mode<synchronous>, transform_indices = @transform_3, window_bounds = array<i64: 128, 128>}, {pipeline_mode = #tpu.pipeline_mode<synchronous>, transform_indices = @transform_4, window_bounds = array<i64: 1, 128>}, {pipeline_mode = #tpu.pipeline_mode<synchronous>, transform_indices = @transform_5, window_bounds = array<i64: 128, 128>}, {pipeline_mode = #tpu.pipeline_mode<synchronous>, transform_indices = @transform_6, window_bounds = array<i64: 1, 128>}, {pipeline_mode = #tpu.pipeline_mode<synchronous>, transform_indices = @transform_7, window_bounds = array<i64: 128, 128>}, {pipeline_mode = #tpu.pipeline_mode<synchronous>, transform_indices = @transform_8, window_bounds = array<i64: 1, 128>}, {transform_indices = @transform_9, window_bounds = array<i64: 8, 128>}]} {
    %c0 = arith.constant 0 : index
    %c0_0 = arith.constant 0 : index
    %0 = vector.load %arg1[%c0, %c0_0] : memref<8x128xf32, #tpu.memory_space<vmem>>, vector<8x128xf32>
    %c0_1 = arith.constant 0 : index
    %c0_2 = arith.constant 0 : index
    %1 = vector.load %arg2[%c0_1, %c0_2] : memref<128x128xf32, #tpu.memory_space<vmem>>, vector<128x128xf32>
    %c0_3 = arith.constant 0 : index
    %c0_4 = arith.constant 0 : index
    %2 = vector.load %arg3[%c0_3, %c0_4] : memref<1x128xf32, #tpu.memory_space<vmem>>, vector<1x128xf32>
    %cst = arith.constant dense<0.000000e+00> : vector<8x128xf32>
    %3 = tpu.matmul %0, %1, %cst {dimension_numbers = #tpu.dot_dimension_numbers<[1], [0], [0], [1], [0, 0, 1, 1], [], []>} : vector<8x128xf32>, vector<128x128xf32>, vector<8x128xf32> -> vector<8x128xf32>
    %4 = vector.broadcast %2 : vector<1x128xf32> to vector<8x128xf32>
    %5 = arith.addf %3, %4 : vector<8x128xf32>
    %cst_5 = arith.constant 0.000000e+00 : f32
    %6 = vector.broadcast %cst_5 : f32 to vector<8x128xf32>
    %7 = arith.maximumf %5, %6 : vector<8x128xf32>
    %c0_6 = arith.constant 0 : index
    %c0_7 = arith.constant 0 : index
    %8 = vector.load %arg4[%c0_6, %c0_7] : memref<128x128xf32, #tpu.memory_space<vmem>>, vector<128x128xf32>
    %c0_8 = arith.constant 0 : index
    %c0_9 = arith.constant 0 : index
    %9 = vector.load %arg5[%c0_8, %c0_9] : memref<1x128xf32, #tpu.memory_space<vmem>>, vector<1x128xf32>
    %cst_10 = arith.constant dense<0.000000e+00> : vector<8x128xf32>
    %10 = tpu.matmul %7, %8, %cst_10 {dimension_numbers = #tpu.dot_dimension_numbers<[1], [0], [0], [1], [0, 0, 1, 1], [], []>} : vector<8x128xf32>, vector<128x128xf32>, vector<8x128xf32> -> vector<8x128xf32>
    %11 = vector.broadcast %9 : vector<1x128xf32> to vector<8x128xf32>
    %12 = arith.addf %10, %11 : vector<8x128xf32>
    %cst_11 = arith.constant 0.000000e+00 : f32
    %13 = vector.broadcast %cst_11 : f32 to vector<8x128xf32>
    %14 = arith.maximumf %12, %13 : vector<8x128xf32>
    %c0_12 = arith.constant 0 : index
    %c0_13 = arith.constant 0 : index
    %15 = vector.load %arg6[%c0_12, %c0_13] : memref<128x128xf32, #tpu.memory_space<vmem>>, vector<128x128xf32>
    %c0_14 = arith.constant 0 : index
    %c0_15 = arith.constant 0 : index
    %16 = vector.load %arg7[%c0_14, %c0_15] : memref<1x128xf32, #tpu.memory_space<vmem>>, vector<1x128xf32>
    %cst_16 = arith.constant dense<0.000000e+00> : vector<8x128xf32>
    %17 = tpu.matmul %14, %15, %cst_16 {dimension_numbers = #tpu.dot_dimension_numbers<[1], [0], [0], [1], [0, 0, 1, 1], [], []>} : vector<8x128xf32>, vector<128x128xf32>, vector<8x128xf32> -> vector<8x128xf32>
    %18 = vector.broadcast %16 : vector<1x128xf32> to vector<8x128xf32>
    %19 = arith.addf %17, %18 : vector<8x128xf32>
    %cst_17 = arith.constant 0.000000e+00 : f32
    %20 = vector.broadcast %cst_17 : f32 to vector<8x128xf32>
    %21 = arith.maximumf %19, %20 : vector<8x128xf32>
    %c0_18 = arith.constant 0 : index
    %c0_19 = arith.constant 0 : index
    %22 = vector.load %arg8[%c0_18, %c0_19] : memref<128x128xf32, #tpu.memory_space<vmem>>, vector<128x128xf32>
    %c0_20 = arith.constant 0 : index
    %c0_21 = arith.constant 0 : index
    %23 = vector.load %arg9[%c0_20, %c0_21] : memref<1x128xf32, #tpu.memory_space<vmem>>, vector<1x128xf32>
    %cst_22 = arith.constant dense<0.000000e+00> : vector<8x128xf32>
    %24 = tpu.matmul %21, %22, %cst_22 {dimension_numbers = #tpu.dot_dimension_numbers<[1], [0], [0], [1], [0, 0, 1, 1], [], []>} : vector<8x128xf32>, vector<128x128xf32>, vector<8x128xf32> -> vector<8x128xf32>
    %25 = vector.broadcast %23 : vector<1x128xf32> to vector<8x128xf32>
    %26 = arith.addf %24, %25 : vector<8x128xf32>
    %cst_23 = arith.constant 0.000000e+00 : f32
    %27 = vector.broadcast %cst_23 : f32 to vector<8x128xf32>
    %28 = arith.maximumf %26, %27 : vector<8x128xf32>
    %c0_24 = arith.constant 0 : index
    %c0_25 = arith.constant 0 : index
    %29 = vector.load %arg10[%c0_24, %c0_25] : memref<8x128xf32, #tpu.memory_space<vmem>>, vector<8x128xf32>
    tpu.vector_store %arg10[%c0_24, %c0_25], %28 {strides = array<i32>} : memref<8x128xf32, #tpu.memory_space<vmem>>, vector<8x128xf32>,
    return
  }
  func.func @transform_0(%arg0: i32) -> (i32, i32) {
    %c0_i32 = arith.constant 0 : i32
    %c0_i32_0 = arith.constant 0 : i32
    return %arg0, %c0_i32 : i32, i32
  }
  func.func @transform_1(%arg0: i32) -> (i32, i32) {
    %c0_i32 = arith.constant 0 : i32
    %c0_i32_0 = arith.constant 0 : i32
    %c0_i32_1 = arith.constant 0 : i32
    return %c0_i32, %c0_i32_0 : i32, i32
  }
  func.func @transform_2(%arg0: i32) -> (i32, i32) {
    %c0_i32 = arith.constant 0 : i32
    %c0_i32_0 = arith.constant 0 : i32
    %c0_i32_1 = arith.constant 0 : i32
    return %c0_i32, %c0_i32_0 : i32, i32
  }
  func.func @transform_3(%arg0: i32) -> (i32, i32) {
    %c0_i32 = arith.constant 0 : i32
    %c0_i32_0 = arith.constant 0 : i32
    %c0_i32_1 = arith.constant 0 : i32
    return %c0_i32, %c0_i32_0 : i32, i32
  }
  func.func @transform_4(%arg0: i32) -> (i32, i32) {
    %c0_i32 = arith.constant 0 : i32
    %c0_i32_0 = arith.constant 0 : i32
    %c0_i32_1 = arith.constant 0 : i32
    return %c0_i32, %c0_i32_0 : i32, i32
  }
  func.func @transform_5(%arg0: i32) -> (i32, i32) {
    %c0_i32 = arith.constant 0 : i32
    %c0_i32_0 = arith.constant 0 : i32
    %c0_i32_1 = arith.constant 0 : i32
    return %c0_i32, %c0_i32_0 : i32, i32
  }
  func.func @transform_6(%arg0: i32) -> (i32, i32) {
    %c0_i32 = arith.constant 0 : i32
    %c0_i32_0 = arith.constant 0 : i32
    %c0_i32_1 = arith.constant 0 : i32
    return %c0_i32, %c0_i32_0 : i32, i32
  }
  func.func @transform_7(%arg0: i32) -> (i32, i32) {
    %c0_i32 = arith.constant 0 : i32
    %c0_i32_0 = arith.constant 0 : i32
    %c0_i32_1 = arith.constant 0 : i32
    return %c0_i32, %c0_i32_0 : i32, i32
  }
  func.func @transform_8(%arg0: i32) -> (i32, i32) {
    %c0_i32 = arith.constant 0 : i32
    %c0_i32_0 = arith.constant 0 : i32
    %c0_i32_1 = arith.constant 0 : i32
    return %c0_i32, %c0_i32_0 : i32, i32
  }
  func.func @transform_9(%arg0: i32) -> (i32, i32) {
    %c0_i32 = arith.constant 0 : i32
    %c0_i32_0 = arith.constant 0 : i32
    return %arg0, %c0_i32 : i32, i32
  }
}

</mosaic_0001>

<bundles_post_ra>
// kernel: tpu_custom_call.1
= control target key start
LH: loop header
LB: loop body
LE: loop exit
PB: predicated region body
PF: predicated region fallthrough
CT: control target
= control target key end

     0   :  { %14 = vsyncpa [#allocation3], 0  ;;  %s1150_s0 = inlined_call_operand.hbm [shape: f32[8,128], index: 0, kind: input, shape index: {}]   ;;  %s1151_s1 = inlined_call_operand.hbm [shape: f32[128,128], index: 1, kind: input, shape index: {}]   ;;  %s1152_s2 = inlined_call_operand.vmem [shape: f32[1,128], index: 2, kind: input, shape index: {}]   ;;  %s1153_s3 = inlined_call_operand.hbm [shape: f32[128,128], index: 3, kind: input, shape index: {}]   ;;  %s1154_s4 = inlined_call_operand.vmem [shape: f32[1,128], index: 4, kind: input, shape index: {}]   ;;  %s1155_s5 = inlined_call_operand.hbm [shape: f32[128,128], index: 5, kind: input, shape index: {}]   ;;  %s1156_s6 = inlined_call_operand.vmem [shape: f32[1,128], index: 6, kind: input, shape index: {}]   ;;  %s1157_s7 = inlined_call_operand.hbm [shape: f32[128,128], index: 7, kind: input, shape index: {}]   ;;  %s1158_s8 = inlined_call_operand.vmem [shape: f32[1,128], index: 8, kind: input, shape index: {}]   ;;  %s1159_s9 = inlined_call_operand.hbm [shape: f32[8,128], index: 9, kind: output, shape index: {}]  }
   0x1   :  { %15 = vsyncpa [#allocation6], 0 }
   0x2   :  { %16 = vsyncpa [#allocation9], 0 }
   0x3   :  { %17 = vsyncpa [#allocation4], 0  ;;  %s953_s30 = smov [#allocation5]   ;;  %s813_s13 = scalar_lea.hbm %s1151_s1, 2048 }
   0x4   :  { %s33_s10 = sshll.u32 %s953_s30, 4  ;;  %p814_p0 = scmp.ne.s32.totalorder %s1151_s1, %s813_s13  ;;  %s34_s10 = int_to_ptr.vmem [resolvable:$true] %s33_s10 }
   0x5   :  { %p817_p1 = scmp.lt.u32.totalorder %s813_s13, %s1151_s1 }
   0x7   :  { %p819_p2 = pnand %p817_p1, %p814_p0 }
   0x9   :  { %822 = shalt.err (!%p819_p2)
}
   0xa   :  { %s823_s18 = scalar_lea.vmem %s34_s10, 2048  ;;  %p828_p4 = scmp.lt.s32.totalorder %s34_s10, %s34_s10 }
   0xb   :  { %p824_p3 = scmp.ne.s32.totalorder %s34_s10, %s823_s18  ;;  %p829_p5 = scmp.lt.s32.totalorder %s823_s18, %s823_s18 }
   0xd   :  { %p830_p6 = por %p829_p5, %p828_p4 }
   0xf   :  { %p831_p7 = pnand %p830_p6, %p824_p3 }
  0x11   :  { %834 = shalt.err (!%p831_p7)
}
  0x12   :  { %s954_s19 = smov 128   ;;  %s955_s20 = smov 8  }
  0x13   :  { %39 = dma.hbm_to_vmem [thread:$0]  %s1151_s1, 2048, %s34_s10, [#allocation6], %s954_s19, %s954_s19, %s955_s20  }
  0x14   :  { %s956_s23 = smov [#allocation8]   ;;  %s957_s25 = smov [#allocation2]  }
  0x15   :  { %s61_s24 = sshll.u32 %s956_s23, 4  ;;  %s24_s26 = sshll.u32 %s957_s25, 4  ;;  %s62_s24 = int_to_ptr.vmem [resolvable:$true] %s61_s24  ;;  %s25_s26 = int_to_ptr.vmem [resolvable:$true] %s24_s26 }
  0x16   :  { %s835_s29 = scalar_lea.hbm %s1155_s5, 2048 }
  0x17   :  { %p836_p8 = scmp.ne.s32.totalorder %s1155_s5, %s835_s29  ;;  %p839_p9 = scmp.lt.u32.totalorder %s835_s29, %s1155_s5 }
  0x19   :  { %p841_p10 = pnand %p839_p9, %p836_p8 }
  0x1b   :  { %844 = shalt.err (!%p841_p10)
}
  0x1c   :  { %s845_s1 = scalar_lea.vmem %s62_s24, 2048  ;;  %p850_p12 = scmp.lt.s32.totalorder %s62_s24, %s62_s24 }
  0x1d   :  { %p846_p11 = scmp.ne.s32.totalorder %s62_s24, %s845_s1  ;;  %p851_p13 = scmp.lt.s32.totalorder %s845_s1, %s845_s1 }
  0x1f   :  { %p852_p0 = por %p851_p13, %p850_p12 }
  0x21   :  { %p853_p1 = pnand %p852_p0, %p846_p11 }
  0x23   :  { %856 = shalt.err (!%p853_p1)
}
  0x24   :  { %67 = dma.hbm_to_vmem [thread:$0]  %s1155_s5, 2048, %s62_s24, [#allocation9], %s954_s19, %s954_s19, %s955_s20  }
  0x25   :  { %s857_s17 = scalar_lea.hbm %s1150_s0, 128 }
  0x26   :  { %p858_p2 = scmp.ne.s32.totalorder %s1150_s0, %s857_s17  ;;  %p861_p3 = scmp.lt.u32.totalorder %s857_s17, %s1150_s0 }
  0x28   :  { %p863_p4 = pnand %p861_p3, %p858_p2 }
  0x2a   :  { %866 = shalt.err (!%p863_p4)
}
  0x2b   :  { %s867_s25 = scalar_lea.vmem %s25_s26, 128  ;;  %p872_p6 = scmp.lt.s32.totalorder %s25_s26, %s25_s26 }
  0x2c   :  { %p868_p5 = scmp.ne.s32.totalorder %s25_s26, %s867_s25  ;;  %p873_p7 = scmp.lt.s32.totalorder %s867_s25, %s867_s25 }
  0x2e   :  { %p874_p8 = por %p873_p7, %p872_p6 }
  0x30   :  { %p875_p9 = pnand %p874_p8, %p868_p5 }
  0x32   :  { %878 = shalt.err (!%p875_p9)
}
  0x33   :  { %27 = dma.hbm_to_vmem [thread:$0]  %s1150_s0, 128, %s25_s26, [#allocation3]  }
  0x34   :  { %s958_s27 = smov [#allocation7]   ;;  %s959_s29 = smov [#allocation10]  }
  0x35   :  { %s47_s28 = sshll.u32 %s958_s27, 4  ;;  %s75_s30 = sshll.u32 %s959_s29, 4  ;;  %s48_s28 = int_to_ptr.vmem [resolvable:$true] %s47_s28  ;;  %s76_s30 = int_to_ptr.vmem [resolvable:$true] %s75_s30 }
  0x36   :  { %s879_s13 = scalar_lea.hbm %s1153_s3, 2048 }
  0x37   :  { %p880_p10 = scmp.ne.s32.totalorder %s1153_s3, %s879_s13  ;;  %p883_p11 = scmp.lt.u32.totalorder %s879_s13, %s1153_s3 }
  0x39   :  { %p885_p12 = pnand %p883_p11, %p880_p10 }
  0x3b   :  { %888 = shalt.err (!%p885_p12)
}
  0x3c   :  { %s889_s0 = scalar_lea.vmem %s48_s28, 2048  ;;  %p894_p0 = scmp.lt.s32.totalorder %s48_s28, %s48_s28 }
  0x3d   :  { %p890_p13 = scmp.ne.s32.totalorder %s48_s28, %s889_s0  ;;  %p895_p1 = scmp.lt.s32.totalorder %s889_s0, %s889_s0 }
  0x3f   :  { %p896_p2 = por %p895_p1, %p894_p0 }
  0x41   :  { %p897_p3 = pnand %p896_p2, %p890_p13 }
  0x43   :  { %900 = shalt.err (!%p897_p3)
}
  0x44   :  { %53 = dma.hbm_to_vmem [thread:$0]  %s1153_s3, 2048, %s48_s28, [#allocation6], %s954_s19, %s954_s19, %s955_s20  }
  0x45   :  { %s901_s21 = scalar_lea.hbm %s1157_s7, 2048 }
  0x46   :  { %p902_p4 = scmp.ne.s32.totalorder %s1157_s7, %s901_s21  ;;  %p905_p5 = scmp.lt.u32.totalorder %s901_s21, %s1157_s7 }
  0x48   :  { %p907_p6 = pnand %p905_p5, %p902_p4 }
  0x4a   :  { %910 = shalt.err (!%p907_p6)
}
  0x4b   :  { %s911_s24 = scalar_lea.vmem %s76_s30, 2048  ;;  %p916_p8 = scmp.lt.s32.totalorder %s76_s30, %s76_s30 }
  0x4c   :  { %p912_p7 = scmp.ne.s32.totalorder %s76_s30, %s911_s24  ;;  %p917_p9 = scmp.lt.s32.totalorder %s911_s24, %s911_s24 }
  0x4e   :  { %p918_p10 = por %p917_p9, %p916_p8 }
  0x50   :  { %p919_p11 = pnand %p918_p10, %p912_p7 }
  0x52   :  { %922 = shalt.err (!%p919_p11)
}
  0x53   :  { %81 = dma.hbm_to_vmem [thread:$0]  %s1157_s7, 2048, %s76_s30, [#allocation9], %s954_s19, %s954_s19, %s955_s20  }
  0x54   :  { %945 = dma.done.wait [#allocation3], 128  }
  0x55   :  { %946 = vsyncadd [#allocation3], 4294967168 }
  0x56   :  { %947 = dma.done.wait [#allocation6], 4096  }
  0x57   :  { %948 = vsyncadd [#allocation6], 4294963200 }
  0x58   :  { %949 = dma.done.wait [#allocation9], 4096  }
  0x59   :  { %950 = vsyncadd [#allocation9], 4294963200  ;;  %v960_v0 = vmov 0.0|0.0   ;;  %vm961_vm0 = vmmov 0   ;;  %v962_v1 = vmov 0.0   ;;  %v100_v2 = vld [vmem:[#allocation5] sm:$0xff] }
  0x5a   :  { %706 = vmatprep.subr.bf16.mxu0 %v960_v0  ;;  %598 = vmatprep.mubr.msk.f32.mxu0 %vm961_vm0, %v962_v1  ;;  %v101_v3 = vld [vmem:[#allocation5 + $0x8] sm:$0xff]  ;;  %v102_v4 = vld [vmem:[#allocation5 + $0x10] sm:$0xff]  ;;  %v103_v6 = vld [vmem:[#allocation5 + $0x18] sm:$0xff]  ;;  %s963_s11 = smov [#allocation11]  }
  0x5b   :  { %730 = vmatprep.subr.bf16.mxu1 %v960_v0  ;;  %633 = vmatprep.mubr.msk.f32.mxu1 %vm961_vm0, %v962_v1  ;;  %v707_v5 = vpack.c.bf16 %v101_v3, %v100_v2  ;;  %v710_v7 = vpack.c.bf16 %v103_v6, %v102_v4  ;;  %v104_v8 = vld [vmem:[#allocation5 + $0x20] sm:$0xff]  ;;  %v105_v9 = vld [vmem:[#allocation5 + $0x28] sm:$0xff]  ;;  %v196_v12 = vld [vmem:[#allocation7 + $0x10] sm:$0xff]  ;;  %s483_s12 = sshll.u32 %s963_s11, 4  ;;  %s484_s12 = int_to_ptr.vmem [resolvable:$true] %s483_s12 }
  0x5c   :  { %v194_v10 = vld [vmem:[#allocation7] sm:$0xff]  ;;  %v195_v11 = vld [vmem:[#allocation7 + $0x8] sm:$0xff]  ;;  %v197_v13 = vld [vmem:[#allocation7 + $0x18] sm:$0xff]  ;;  %v713_v14 = vpack.c.bf16 %v105_v9, %v104_v8  ;;  %s923_s13 = scalar_lea.vmem %s484_s12, 128  ;;  %p928_p13 = scmp.lt.s32.totalorder %s484_s12, %s484_s12 }
  0x5d   :  { %708 = vmatpush3.bf16.msra.mxu0 %v707_v5  ;;  %v731_v15 = vpack.c.bf16 %v195_v11, %v194_v10  ;;  %v106_v16 = vld [vmem:[#allocation5 + $0x30] sm:$0xff]  ;;  %v107_v17 = vld [vmem:[#allocation5 + $0x38] sm:$0xff]  ;;  %v734_v18 = vpack.c.bf16 %v197_v13, %v196_v12  ;;  %v198_v19 = vld [vmem:[#allocation7 + $0x20] sm:$0xff]  ;;  %p924_p12 = scmp.ne.s32.totalorder %s484_s12, %s923_s13  ;;  %p929_p0 = scmp.lt.s32.totalorder %s923_s13, %s923_s13 }
  0x5e   :  { %709 = vmatprep.subr.bf16.mxu0 %v960_v0  ;;  %v199_v20 = vld [vmem:[#allocation7 + $0x28] sm:$0xff]  ;;  %v716_v21 = vpack.c.bf16 %v107_v17, %v106_v16  ;;  %v108_v22 = vld [vmem:[#allocation5 + $0x40] sm:$0xff]  ;;  %v200_v25 = vld [vmem:[#allocation7 + $0x30] sm:$0xff] }
  0x5f   :  { %732 = vmatpush3.bf16.msra.mxu1 %v731_v15  ;;  %v109_v23 = vld [vmem:[#allocation5 + $0x48] sm:$0xff]  ;;  %v737_v24 = vpack.c.bf16 %v199_v20, %v198_v19  ;;  %v201_v26 = vld [vmem:[#allocation7 + $0x38] sm:$0xff]  ;;  %v110_v28 = vld [vmem:[#allocation5 + $0x50] sm:$0xff]  ;;  %p930_p1 = por %p929_p0, %p928_p13 }
  0x60   :  { %733 = vmatprep.subr.bf16.mxu1 %v960_v0  ;;  %v719_v27 = vpack.c.bf16 %v109_v23, %v108_v22  ;;  %v111_v29 = vld [vmem:[#allocation5 + $0x58] sm:$0xff]  ;;  %v740_v30 = vpack.c.bf16 %v201_v26, %v200_v25  ;;  %v202_v31 = vld [vmem:[#allocation7 + $0x40] sm:$0xff]  ;;  %v203_v32 = vld [vmem:[#allocation7 + $0x48] sm:$0xff] }
  0x61   :  { %711 = vmatpush3.bf16.msra.mxu0 %v710_v7  ;;  %v722_v33 = vpack.c.bf16 %v111_v29, %v110_v28  ;;  %v112_v34 = vld [vmem:[#allocation5 + $0x60] sm:$0xff]  ;;  %v113_v35 = vld [vmem:[#allocation5 + $0x68] sm:$0xff]  ;;  %v743_v36 = vpack.c.bf16 %v203_v32, %v202_v31  ;;  %v204_v37 = vld [vmem:[#allocation7 + $0x50] sm:$0xff]  ;;  %p931_p2 = pnand %p930_p1, %p924_p12 }
  0x62   :  { %712 = vmatprep.subr.bf16.mxu0 %v960_v0  ;;  %v205_v38 = vld [vmem:[#allocation7 + $0x58] sm:$0xff]  ;;  %v725_v39 = vpack.c.bf16 %v113_v35, %v112_v34  ;;  %v114_v40 = vld [vmem:[#allocation5 + $0x70] sm:$0xff]  ;;  %v206_v43 = vld [vmem:[#allocation7 + $0x60] sm:$0xff] }
  0x63   :  { %735 = vmatpush3.bf16.msra.mxu1 %v734_v18  ;;  %v115_v41 = vld [vmem:[#allocation5 + $0x78] sm:$0xff]  ;;  %v746_v42 = vpack.c.bf16 %v205_v38, %v204_v37  ;;  %v207_v44 = vld [vmem:[#allocation7 + $0x68] sm:$0xff]  ;;  %v208_v48 = vld [vmem:[#allocation7 + $0x70] sm:$0xff] }
  0x64   :  { %736 = vmatprep.subr.bf16.mxu1 %v960_v0  ;;  %v728_v45 = vpack.c.bf16 %v115_v41, %v114_v40  ;;  %v749_v46 = vpack.c.bf16 %v207_v44, %v206_v43  ;;  %v99_v47 = vld [vmem:[#allocation2] sm:$0xff]  ;;  %v288_v51 = vld [vmem:[#allocation8] sm:$0xff]  ;;  %v289_v52 = vld [vmem:[#allocation8 + $0x8] sm:$0xff] }
  0x65   :  { %714 = vmatpush3.bf16.msra.mxu0 %v713_v14  ;;  %v209_v49 = vld [vmem:[#allocation7 + $0x78] sm:$0xff]  ;;  %v290_v53 = vld [vmem:[#allocation8 + $0x10] sm:$0xff]  ;;  %v755_v54 = vpack.c.bf16 %v289_v52, %v288_v51  ;;  %v292_v57 = vld [vmem:[#allocation8 + $0x20] sm:$0xff] }
  0x66   :  { %715 = vmatprep.subr.bf16.mxu0 %v960_v0  ;;  %v752_v50 = vpack.c.bf16 %v209_v49, %v208_v48  ;;  %v291_v55 = vld [vmem:[#allocation8 + $0x18] sm:$0xff]  ;;  %v293_v58 = vld [vmem:[#allocation8 + $0x28] sm:$0xff]  ;;  %v294_v60 = vld [vmem:[#allocation8 + $0x30] sm:$0xff] }
  0x67   :  { %738 = vmatpush3.bf16.msra.mxu1 %v737_v24  ;;  %v758_v56 = vpack.c.bf16 %v291_v55, %v290_v53  ;;  %v761_v59 = vpack.c.bf16 %v293_v58, %v292_v57  ;;  %v295_v61 = vld [vmem:[#allocation8 + $0x38] sm:$0xff]  ;;  %v296_v63 = vld [vmem:[#allocation8 + $0x40] sm:$0xff]  ;;  %v297_v2 = vld [vmem:[#allocation8 + $0x48] sm:$0xff] }
  0x68   :  { %739 = vmatprep.subr.bf16.mxu1 %v960_v0  ;;  %v764_v62 = vpack.c.bf16 %v295_v61, %v294_v60  ;;  %v767_v3 = vpack.c.bf16 %v297_v2, %v296_v63  ;;  %v298_v4 = vld [vmem:[#allocation8 + $0x50] sm:$0xff]  ;;  %v299_v5 = vld [vmem:[#allocation8 + $0x58] sm:$0xff]  ;;  %v300_v7 = vld [vmem:[#allocation8 + $0x60] sm:$0xff] }
  0x69   :  { %717 = vmatpush3.bf16.msra.mxu0 %v716_v21  ;;  %v770_v6 = vpack.c.bf16 %v299_v5, %v298_v4  ;;  %v301_v8 = vld [vmem:[#allocation8 + $0x68] sm:$0xff]  ;;  %v494_v10 = vld [vmem:[%s1152_s2] ss:$0 sm:$0xff]  ;;  %v302_v15 = vld [vmem:[#allocation8 + $0x70] sm:$0xff] }
  0x6a   :  { %718 = vmatprep.subr.bf16.mxu0 %v960_v0  ;;  %v773_v9 = vpack.c.bf16 %v301_v8, %v300_v7  ;;  %v303_v16 = vld [vmem:[#allocation8 + $0x78] sm:$0xff]  ;;  %v382_v18 = vld [vmem:[#allocation10] sm:$0xff]  ;;  %v383_v19 = vld [vmem:[#allocation10 + $0x8] sm:$0xff] }
  0x6b   :  { %741 = vmatpush3.bf16.msra.mxu1 %v740_v30  ;;  %v776_v17 = vpack.c.bf16 %v303_v16, %v302_v15  ;;  %v384_v20 = vld [vmem:[#allocation10 + $0x10] sm:$0xff]  ;;  %v779_v21 = vpack.c.bf16 %v383_v19, %v382_v18  ;;  %v385_v22 = vld [vmem:[#allocation10 + $0x18] sm:$0xff]  ;;  %v386_v24 = vld [vmem:[#allocation10 + $0x20] sm:$0xff] }
  0x6c   :  { %742 = vmatprep.subr.bf16.mxu1 %v960_v0  ;;  %v782_v23 = vpack.c.bf16 %v385_v22, %v384_v20  ;;  %v387_v25 = vld [vmem:[#allocation10 + $0x28] sm:$0xff]  ;;  %v390_v29 = vld [vmem:[#allocation10 + $0x40] sm:$0xff]  ;;  %v392_v32 = vld [vmem:[#allocation10 + $0x50] sm:$0xff] }
  0x6d   :  { %720 = vmatpush3.bf16.msra.mxu0 %v719_v27  ;;  %v785_v26 = vpack.c.bf16 %v387_v25, %v386_v24  ;;  %v389_v27 = vld [vmem:[#allocation10 + $0x38] sm:$0xff]  ;;  %v391_v30 = vld [vmem:[#allocation10 + $0x48] sm:$0xff]  ;;  %v394_v35 = vld [vmem:[#allocation10 + $0x60] sm:$0xff] }
  0x6e   :  { %721 = vmatprep.subr.bf16.mxu0 %v960_v0  ;;  %v791_v31 = vpack.c.bf16 %v391_v30, %v390_v29  ;;  %v495_v38 = vld [vmem:[%s1154_s4] ss:$0 sm:$0xff]  ;;  %v396_v43 = vld [vmem:[#allocation10 + $0x70] sm:$0xff] }
  0x6f   :  { %744 = vmatpush3.bf16.msra.mxu1 %v743_v36  ;;  %v395_v36 = vld [vmem:[#allocation10 + $0x68] sm:$0xff]  ;;  %v397_v44 = vld [vmem:[#allocation10 + $0x78] sm:$0xff] }
  0x70   :  { %745 = vmatprep.subr.bf16.mxu1 %v960_v0  ;;  %v797_v37 = vpack.c.bf16 %v395_v36, %v394_v35 }
  0x71   :  { %723 = vmatpush3.bf16.msra.mxu0 %v722_v33  ;;  %v393_v33 = vld [vmem:[#allocation10 + $0x58] sm:$0xff] }
  0x72   :  { %724 = vmatprep.subr.bf16.mxu0 %v960_v0  ;;  %v794_v34 = vpack.c.bf16 %v393_v33, %v392_v32 }
  0x73   :  { %747 = vmatpush3.bf16.msra.mxu1 %v746_v42 }
  0x74   :  { %748 = vmatprep.subr.bf16.mxu1 %v960_v0 }
  0x75   :  { %726 = vmatpush3.bf16.msra.mxu0 %v725_v39 }
  0x76   :  { %727 = vmatprep.subr.bf16.mxu0 %v960_v0 }
  0x77   :  { %750 = vmatpush3.bf16.msra.mxu1 %v749_v46  ;;  %v496_v46 = vld [vmem:[%s1156_s6] ss:$0 sm:$0xff] }
  0x78   :  { %751 = vmatprep.subr.bf16.mxu1 %v960_v0 }
  0x79   :  { %729 = vmatpush3.bf16.msra.mxu0 %v728_v45  ;;  %v800_v45 = vpack.c.bf16 %v397_v44, %v396_v43 }
  0x7a   :  { %754 = vmatprep.subr.bf16.mxu0 %v960_v0 }
  0x7b   :  { %753 = vmatpush3.bf16.msra.mxu1 %v752_v50  ;;  %v497_v50 = vld [vmem:[%s1158_s8] ss:$0 sm:$0xff] }
  0x7c   :  { %599 = vmatmul.mubr.f32.vlgmr.msra.gmra.mrb[0].mxu0 %v99_v47  ;;  %778 = vmatprep.subr.bf16.mxu1 %v960_v0 }
  0x7d   :  { %668 = vmatprep.mubr.msk.f32.mxu0 %vm961_vm0, %v962_v1  ;;  %756 = vmatpush3.bf16.msra.mxu0 %v755_v54 }
  0x7e   :  { %757 = vmatprep.subr.bf16.mxu0 %v960_v0 }
  0x81   :  { %759 = vmatpush3.bf16.msra.mxu0 %v758_v56 }
  0x82   :  { %760 = vmatprep.subr.bf16.mxu0 %v960_v0 }
  0x85   :  { %762 = vmatpush3.bf16.msra.mxu0 %v761_v59 }
  0x86   :  { %763 = vmatprep.subr.bf16.mxu0 %v960_v0 }
  0x89   :  { %765 = vmatpush3.bf16.msra.mxu0 %v764_v62 }
  0x8a   :  { %766 = vmatprep.subr.bf16.mxu0 %v960_v0 }
  0x8d   :  { %768 = vmatpush3.bf16.msra.mxu0 %v767_v3 }
  0x8e   :  { %769 = vmatprep.subr.bf16.mxu0 %v960_v0 }
  0x91   :  { %771 = vmatpush3.bf16.msra.mxu0 %v770_v6 }
  0x92   :  { %772 = vmatprep.subr.bf16.mxu0 %v960_v0 }
  0x95   :  { %774 = vmatpush3.bf16.msra.mxu0 %v773_v9 }
  0x96   :  { %775 = vmatprep.subr.bf16.mxu0 %v960_v0 }
  0x99   :  { %777 = vmatpush3.bf16.msra.mxu0 %v776_v17 }
 0x14f   :  { %v189_v11 = vpop.f32.mrb[0].mxu0 }
 0x150   :  { %v190_v12 = vadd.f32 %v494_v10, %v189_v11  ;;  %v600_v13 = vpop.f32.mrb[1].mxu0 }
 0x152   :  { %v193_v14 = vmax.f32 %v190_v12, 0.0 }
 0x154   :  { %634 = vmatmul.mubr.f32.vlgmr.msra.gmra.mrb[0].mxu1 %v193_v14 }
 0x155   :  { %703 = vmatprep.mubr.msk.f32.mxu1 %vm961_vm0, %v962_v1  ;;  %780 = vmatpush3.bf16.msra.mxu1 %v779_v21  ;;  %v388_v1 = vld [vmem:[#allocation10 + $0x30] sm:$0xff] }
 0x156   :  { %781 = vmatprep.subr.bf16.mxu1 %v960_v0  ;;  %v788_v28 = vpack.c.bf16 %v389_v27, %v388_v1 }
 0x159   :  { %783 = vmatpush3.bf16.msra.mxu1 %v782_v23 }
 0x15a   :  { %784 = vmatprep.subr.bf16.mxu1 %v960_v0 }
 0x15d   :  { %786 = vmatpush3.bf16.msra.mxu1 %v785_v26 }
 0x15e   :  { %787 = vmatprep.subr.bf16.mxu1 %v960_v0 }
 0x161   :  { %789 = vmatpush3.bf16.msra.mxu1 %v788_v28 }
 0x162   :  { %790 = vmatprep.subr.bf16.mxu1 %v960_v0 }
 0x165   :  { %792 = vmatpush3.bf16.msra.mxu1 %v791_v31 }
 0x166   :  { %793 = vmatprep.subr.bf16.mxu1 %v960_v0 }
 0x169   :  { %795 = vmatpush3.bf16.msra.mxu1 %v794_v34 }
 0x16a   :  { %796 = vmatprep.subr.bf16.mxu1 %v960_v0 }
 0x16d   :  { %798 = vmatpush3.bf16.msra.mxu1 %v797_v37 }
 0x16e   :  { %799 = vmatprep.subr.bf16.mxu1 %v960_v0 }
 0x171   :  { %801 = vmatpush3.bf16.msra.mxu1 %v800_v45 }
 0x227   :  { %v283_v39 = vpop.f32.mrb[0].mxu1 }
 0x228   :  { %v284_v40 = vadd.f32 %v495_v38, %v283_v39  ;;  %v635_v41 = vpop.f32.mrb[1].mxu1 }
 0x22a   :  { %v287_v42 = vmax.f32 %v284_v40, 0.0 }
 0x22c   :  { %669 = vmatmul.mubr.f32.vlgmr.msra.gmra.mrb[2].mxu0 %v287_v42 }
 0x2ff   :  { %v377_v47 = vpop.f32.mrb[2].mxu0 }
 0x300   :  { %v378_v48 = vadd.f32 %v496_v46, %v377_v47  ;;  %v670_v0 = vpop.f32.mrb[3].mxu0 }
 0x302   :  { %v381_v49 = vmax.f32 %v378_v48, 0.0 }
 0x304   :  { %704 = vmatmul.mubr.f32.vlgmr.msra.gmra.mrb[2].mxu1 %v381_v49 }
 0x3d7   :  { %v471_v51 = vpop.f32.mrb[2].mxu1 }
 0x3d8   :  { %v472_v52 = vadd.f32 %v497_v50, %v471_v51  ;;  %v705_v53 = vpop.f32.mrb[3].mxu1 }
 0x3da   :  { %v475_v54 = vmax.f32 %v472_v52, 0.0 }
 0x3dc   :  { %476 = vst [vmem:[#allocation11] sm:$0xff] %v475_v54 }
 0x3dd   :  { %934 = shalt.err (!%p931_p2)
}
 0x3de   :  { %s935_s10 = scalar_lea.hbm %s1159_s9, 128 }
 0x3df   :  { %p936_p3 = scmp.ne.s32.totalorder %s1159_s9, %s935_s10  ;;  %p939_p4 = scmp.lt.u32.totalorder %s935_s10, %s1159_s9 }
 0x3e1   :  { %p941_p5 = pnand %p939_p4, %p936_p3 }
 0x3e3   :  { %944 = shalt.err (!%p941_p5)
}
 0x3e4   :  { %486 = dma.vmem_to_hbm [thread:$0]  %s484_s12, 128, %s1159_s9, [#allocation4]  }
 0x3e5   :  { %951 = dma.done.wait [#allocation4], 128  }
 0x3e6   :  { %952 = vsyncadd [#allocation4], 4294967168 }
 0x3e7   :  { %490 = vsyncpa [#allocation3], 1 }
 0x3e8   :  { %491 = vsyncpa [#allocation6], 1 }
 0x3e9   :  { %492 = vsyncpa [#allocation9], 1 }
 0x3ea   :  { %493 = vsyncpa [#allocation4], 1 }

// kernel: tpu_custom_call.1
= control target key start
LH: loop header
LB: loop body
LE: loop exit
PB: predicated region body
PF: predicated region fallthrough
CT: control target
= control target key end

     0   :  { %14 = vsyncpa [#allocation3], 0  ;;  %s1150_s0 = inlined_call_operand.hbm [shape: f32[8,128], index: 0, kind: input, shape index: {}]   ;;  %s1151_s1 = inlined_call_operand.hbm [shape: f32[128,128], index: 1, kind: input, shape index: {}]   ;;  %s1152_s2 = inlined_call_operand.vmem [shape: f32[1,128], index: 2, kind: input, shape index: {}]   ;;  %s1153_s3 = inlined_call_operand.hbm [shape: f32[128,128], index: 3, kind: input, shape index: {}]   ;;  %s1154_s4 = inlined_call_operand.vmem [shape: f32[1,128], index: 4, kind: input, shape index: {}]   ;;  %s1155_s5 = inlined_call_operand.hbm [shape: f32[128,128], index: 5, kind: input, shape index: {}]   ;;  %s1156_s6 = inlined_call_operand.vmem [shape: f32[1,128], index: 6, kind: input, shape index: {}]   ;;  %s1157_s7 = inlined_call_operand.hbm [shape: f32[128,128], index: 7, kind: input, shape index: {}]   ;;  %s1158_s8 = inlined_call_operand.vmem [shape: f32[1,128], index: 8, kind: input, shape index: {}]   ;;  %s1159_s9 = inlined_call_operand.hbm [shape: f32[8,128], index: 9, kind: output, shape index: {}]  }
   0x1   :  { %15 = vsyncpa [#allocation6], 0 }
   0x2   :  { %16 = vsyncpa [#allocation9], 0 }
   0x3   :  { %17 = vsyncpa [#allocation4], 0  ;;  %s953_s30 = smov [#allocation5]   ;;  %s813_s13 = scalar_lea.hbm %s1151_s1, 2048 }
   0x4   :  { %s33_s10 = sshll.u32 %s953_s30, 4  ;;  %p814_p0 = scmp.ne.s32.totalorder %s1151_s1, %s813_s13  ;;  %s34_s10 = int_to_ptr.vmem [resolvable:$true] %s33_s10 }
   0x5   :  { %p817_p1 = scmp.lt.u32.totalorder %s813_s13, %s1151_s1 }
   0x7   :  { %p819_p2 = pnand %p817_p1, %p814_p0 }
   0x9   :  { %822 = shalt.err (!%p819_p2)
}
   0xa   :  { %s823_s18 = scalar_lea.vmem %s34_s10, 2048  ;;  %p828_p4 = scmp.lt.s32.totalorder %s34_s10, %s34_s10 }
   0xb   :  { %p824_p3 = scmp.ne.s32.totalorder %s34_s10, %s823_s18  ;;  %p829_p5 = scmp.lt.s32.totalorder %s823_s18, %s823_s18 }
   0xd   :  { %p830_p6 = por %p829_p5, %p828_p4 }
   0xf   :  { %p831_p7 = pnand %p830_p6, %p824_p3 }
  0x11   :  { %834 = shalt.err (!%p831_p7)
}
  0x12   :  { %s954_s19 = smov 128   ;;  %s955_s20 = smov 8  }
  0x13   :  { %39 = dma.hbm_to_vmem [thread:$0]  %s1151_s1, 2048, %s34_s10, [#allocation6], %s954_s19, %s954_s19, %s955_s20  }
  0x14   :  { %s956_s23 = smov [#allocation8]   ;;  %s957_s25 = smov [#allocation2]  }
  0x15   :  { %s61_s24 = sshll.u32 %s956_s23, 4  ;;  %s24_s26 = sshll.u32 %s957_s25, 4  ;;  %s62_s24 = int_to_ptr.vmem [resolvable:$true] %s61_s24  ;;  %s25_s26 = int_to_ptr.vmem [resolvable:$true] %s24_s26 }
  0x16   :  { %s835_s29 = scalar_lea.hbm %s1155_s5, 2048 }
  0x17   :  { %p836_p8 = scmp.ne.s32.totalorder %s1155_s5, %s835_s29  ;;  %p839_p9 = scmp.lt.u32.totalorder %s835_s29, %s1155_s5 }
  0x19   :  { %p841_p10 = pnand %p839_p9, %p836_p8 }
  0x1b   :  { %844 = shalt.err (!%p841_p10)
}
  0x1c   :  { %s845_s1 = scalar_lea.vmem %s62_s24, 2048  ;;  %p850_p12 = scmp.lt.s32.totalorder %s62_s24, %s62_s24 }
  0x1d   :  { %p846_p11 = scmp.ne.s32.totalorder %s62_s24, %s845_s1  ;;  %p851_p13 = scmp.lt.s32.totalorder %s845_s1, %s845_s1 }
  0x1f   :  { %p852_p0 = por %p851_p13, %p850_p12 }
  0x21   :  { %p853_p1 = pnand %p852_p0, %p846_p11 }
  0x23   :  { %856 = shalt.err (!%p853_p1)
}
  0x24   :  { %67 = dma.hbm_to_vmem [thread:$0]  %s1155_s5, 2048, %s62_s24, [#allocation9], %s954_s19, %s954_s19, %s955_s20  }
  0x25   :  { %s857_s17 = scalar_lea.hbm %s1150_s0, 128 }
  0x26   :  { %p858_p2 = scmp.ne.s32.totalorder %s1150_s0, %s857_s17  ;;  %p861_p3 = scmp.lt.u32.totalorder %s857_s17, %s1150_s0 }
  0x28   :  { %p863_p4 = pnand %p861_p3, %p858_p2 }
  0x2a   :  { %866 = shalt.err (!%p863_p4)
}
  0x2b   :  { %s867_s25 = scalar_lea.vmem %s25_s26, 128  ;;  %p872_p6 = scmp.lt.s32.totalorder %s25_s26, %s25_s26 }
  0x2c   :  { %p868_p5 = scmp.ne.s32.totalorder %s25_s26, %s867_s25  ;;  %p873_p7 = scmp.lt.s32.totalorder %s867_s25, %s867_s25 }
  0x2e   :  { %p874_p8 = por %p873_p7, %p872_p6 }
  0x30   :  { %p875_p9 = pnand %p874_p8, %p868_p5 }
  0x32   :  { %878 = shalt.err (!%p875_p9)
}
  0x33   :  { %27 = dma.hbm_to_vmem [thread:$0]  %s1150_s0, 128, %s25_s26, [#allocation3]  }
  0x34   :  { %s958_s27 = smov [#allocation7]   ;;  %s959_s29 = smov [#allocation10]  }
  0x35   :  { %s47_s28 = sshll.u32 %s958_s27, 4  ;;  %s75_s30 = sshll.u32 %s959_s29, 4  ;;  %s48_s28 = int_to_ptr.vmem [resolvable:$true] %s47_s28  ;;  %s76_s30 = int_to_ptr.vmem [resolvable:$true] %s75_s30 }
  0x36   :  { %s879_s13 = scalar_lea.hbm %s1153_s3, 2048 }
  0x37   :  { %p880_p10 = scmp.ne.s32.totalorder %s1153_s3, %s879_s13  ;;  %p883_p11 = scmp.lt.u32.totalorder %s879_s13, %s1153_s3 }
  0x39   :  { %p885_p12 = pnand %p883_p11, %p880_p10 }
  0x3b   :  { %888 = shalt.err (!%p885_p12)
}
  0x3c   :  { %s889_s0 = scalar_lea.vmem %s48_s28, 2048  ;;  %p894_p0 = scmp.lt.s32.totalorder %s48_s28, %s48_s28 }
  0x3d   :  { %p890_p13 = scmp.ne.s32.totalorder %s48_s28, %s889_s0  ;;  %p895_p1 = scmp.lt.s32.totalorder %s889_s0, %s889_s0 }
  0x3f   :  { %p896_p2 = por %p895_p1, %p894_p0 }
  0x41   :  { %p897_p3 = pnand %p896_p2, %p890_p13 }
  0x43   :  { %900 = shalt.err (!%p897_p3)
}
  0x44   :  { %53 = dma.hbm_to_vmem [thread:$0]  %s1153_s3, 2048, %s48_s28, [#allocation6], %s954_s19, %s954_s19, %s955_s20  }
  0x45   :  { %s901_s21 = scalar_lea.hbm %s1157_s7, 2048 }
  0x46   :  { %p902_p4 = scmp.ne.s32.totalorder %s1157_s7, %s901_s21  ;;  %p905_p5 = scmp.lt.u32.totalorder %s901_s21, %s1157_s7 }
  0x48   :  { %p907_p6 = pnand %p905_p5, %p902_p4 }
  0x4a   :  { %910 = shalt.err (!%p907_p6)
}
  0x4b   :  { %s911_s24 = scalar_lea.vmem %s76_s30, 2048  ;;  %p916_p8 = scmp.lt.s32.totalorder %s76_s30, %s76_s30 }
  0x4c   :  { %p912_p7 = scmp.ne.s32.totalorder %s76_s30, %s911_s24  ;;  %p917_p9 = scmp.lt.s32.totalorder %s911_s24, %s911_s24 }
  0x4e   :  { %p918_p10 = por %p917_p9, %p916_p8 }
  0x50   :  { %p919_p11 = pnand %p918_p10, %p912_p7 }
  0x52   :  { %922 = shalt.err (!%p919_p11)
}
  0x53   :  { %81 = dma.hbm_to_vmem [thread:$0]  %s1157_s7, 2048, %s76_s30, [#allocation9], %s954_s19, %s954_s19, %s955_s20  }
  0x54   :  { %945 = dma.done.wait [#allocation3], 128  }
  0x55   :  { %946 = vsyncadd [#allocation3], 4294967168 }
  0x56   :  { %947 = dma.done.wait [#allocation6], 4096  }
  0x57   :  { %948 = vsyncadd [#allocation6], 4294963200 }
  0x58   :  { %949 = dma.done.wait [#allocation9], 4096  }
  0x59   :  { %950 = vsyncadd [#allocation9], 4294963200  ;;  %v960_v0 = vmov 0.0|0.0   ;;  %vm961_vm0 = vmmov 0   ;;  %v962_v1 = vmov 0.0   ;;  %v100_v2 = vld [vmem:[#allocation5] sm:$0xff] }
  0x5a   :  { %706 = vmatprep.subr.bf16.mxu0 %v960_v0  ;;  %598 = vmatprep.mubr.msk.f32.mxu0 %vm961_vm0, %v962_v1  ;;  %v101_v3 = vld [vmem:[#allocation5 + $0x8] sm:$0xff]  ;;  %v102_v4 = vld [vmem:[#allocation5 + $0x10] sm:$0xff]  ;;  %v103_v6 = vld [vmem:[#allocation5 + $0x18] sm:$0xff]  ;;  %s963_s11 = smov [#allocation11]  }
  0x5b   :  { %730 = vmatprep.subr.bf16.mxu1 %v960_v0  ;;  %633 = vmatprep.mubr.msk.f32.mxu1 %vm961_vm0, %v962_v1  ;;  %v707_v5 = vpack.c.bf16 %v101_v3, %v100_v2  ;;  %v710_v7 = vpack.c.bf16 %v103_v6, %v102_v4  ;;  %v104_v8 = vld [vmem:[#allocation5 + $0x20] sm:$0xff]  ;;  %v105_v9 = vld [vmem:[#allocation5 + $0x28] sm:$0xff]  ;;  %v196_v12 = vld [vmem:[#allocation7 + $0x10] sm:$0xff]  ;;  %s483_s12 = sshll.u32 %s963_s11, 4  ;;  %s484_s12 = int_to_ptr.vmem [resolvable:$true] %s483_s12 }
  0x5c   :  { %v194_v10 = vld [vmem:[#allocation7] sm:$0xff]  ;;  %v195_v11 = vld [vmem:[#allocation7 + $0x8] sm:$0xff]  ;;  %v197_v13 = vld [vmem:[#allocation7 + $0x18] sm:$0xff]  ;;  %v713_v14 = vpack.c.bf16 %v105_v9, %v104_v8  ;;  %s923_s13 = scalar_lea.vmem %s484_s12, 128  ;;  %p928_p13 = scmp.lt.s32.totalorder %s484_s12, %s484_s12 }
  0x5d   :  { %708 = vmatpush3.bf16.msra.mxu0 %v707_v5  ;;  %v731_v15 = vpack.c.bf16 %v195_v11, %v194_v10  ;;  %v106_v16 = vld [vmem:[#allocation5 + $0x30] sm:$0xff]  ;;  %v107_v17 = vld [vmem:[#allocation5 + $0x38] sm:$0xff]  ;;  %v734_v18 = vpack.c.bf16 %v197_v13, %v196_v12  ;;  %v198_v19 = vld [vmem:[#allocation7 + $0x20] sm:$0xff]  ;;  %p924_p12 = scmp.ne.s32.totalorder %s484_s12, %s923_s13  ;;  %p929_p0 = scmp.lt.s32.totalorder %s923_s13, %s923_s13 }
  0x5e   :  { %709 = vmatprep.subr.bf16.mxu0 %v960_v0  ;;  %v199_v20 = vld [vmem:[#allocation7 + $0x28] sm:$0xff]  ;;  %v716_v21 = vpack.c.bf16 %v107_v17, %v106_v16  ;;  %v108_v22 = vld [vmem:[#allocation5 + $0x40] sm:$0xff]  ;;  %v200_v25 = vld [vmem:[#allocation7 + $0x30] sm:$0xff] }
  0x5f   :  { %732 = vmatpush3.bf16.msra.mxu1 %v731_v15  ;;  %v109_v23 = vld [vmem:[#allocation5 + $0x48] sm:$0xff]  ;;  %v737_v24 = vpack.c.bf16 %v199_v20, %v198_v19  ;;  %v201_v26 = vld [vmem:[#allocation7 + $0x38] sm:$0xff]  ;;  %v110_v28 = vld [vmem:[#allocation5 + $0x50] sm:$0xff]  ;;  %p930_p1 = por %p929_p0, %p928_p13 }
  0x60   :  { %733 = vmatprep.subr.bf16.mxu1 %v960_v0  ;;  %v719_v27 = vpack.c.bf16 %v109_v23, %v108_v22  ;;  %v111_v29 = vld [vmem:[#allocation5 + $0x58] sm:$0xff]  ;;  %v740_v30 = vpack.c.bf16 %v201_v26, %v200_v25  ;;  %v202_v31 = vld [vmem:[#allocation7 + $0x40] sm:$0xff]  ;;  %v203_v32 = vld [vmem:[#allocation7 + $0x48] sm:$0xff] }
  0x61   :  { %711 = vmatpush3.bf16.msra.mxu0 %v710_v7  ;;  %v722_v33 = vpack.c.bf16 %v111_v29, %v110_v28  ;;  %v112_v34 = vld [vmem:[#allocation5 + $0x60] sm:$0xff]  ;;  %v113_v35 = vld [vmem:[#allocation5 + $0x68] sm:$0xff]  ;;  %v743_v36 = vpack.c.bf16 %v203_v32, %v202_v31  ;;  %v204_v37 = vld [vmem:[#allocation7 + $0x50] sm:$0xff]  ;;  %p931_p2 = pnand %p930_p1, %p924_p12 }
  0x62   :  { %712 = vmatprep.subr.bf16.mxu0 %v960_v0  ;;  %v205_v38 = vld [vmem:[#allocation7 + $0x58] sm:$0xff]  ;;  %v725_v39 = vpack.c.bf16 %v113_v35, %v112_v34  ;;  %v114_v40 = vld [vmem:[#allocation5 + $0x70] sm:$0xff]  ;;  %v206_v43 = vld [vmem:[#allocation7 + $0x60] sm:$0xff] }
  0x63   :  { %735 = vmatpush3.bf16.msra.mxu1 %v734_v18  ;;  %v115_v41 = vld [vmem:[#allocation5 + $0x78] sm:$0xff]  ;;  %v746_v42 = vpack.c.bf16 %v205_v38, %v204_v37  ;;  %v207_v44 = vld [vmem:[#allocation7 + $0x68] sm:$0xff]  ;;  %v208_v48 = vld [vmem:[#allocation7 + $0x70] sm:$0xff] }
  0x64   :  { %736 = vmatprep.subr.bf16.mxu1 %v960_v0  ;;  %v728_v45 = vpack.c.bf16 %v115_v41, %v114_v40  ;;  %v749_v46 = vpack.c.bf16 %v207_v44, %v206_v43  ;;  %v99_v47 = vld [vmem:[#allocation2] sm:$0xff]  ;;  %v288_v51 = vld [vmem:[#allocation8] sm:$0xff]  ;;  %v289_v52 = vld [vmem:[#allocation8 + $0x8] sm:$0xff] }
  0x65   :  { %714 = vmatpush3.bf16.msra.mxu0 %v713_v14  ;;  %v209_v49 = vld [vmem:[#allocation7 + $0x78] sm:$0xff]  ;;  %v290_v53 = vld [vmem:[#allocation8 + $0x10] sm:$0xff]  ;;  %v755_v54 = vpack.c.bf16 %v289_v52, %v288_v51  ;;  %v292_v57 = vld [vmem:[#allocation8 + $0x20] sm:$0xff] }
  0x66   :  { %715 = vmatprep.subr.bf16.mxu0 %v960_v0  ;;  %v752_v50 = vpack.c.bf16 %v209_v49, %v208_v48  ;;  %v291_v55 = vld [vmem:[#allocation8 + $0x18] sm:$0xff]  ;;  %v293_v58 = vld [vmem:[#allocation8 + $0x28] sm:$0xff]  ;;  %v294_v60 = vld [vmem:[#allocation8 + $0x30] sm:$0xff] }
  0x67   :  { %738 = vmatpush3.bf16.msra.mxu1 %v737_v24  ;;  %v758_v56 = vpack.c.bf16 %v291_v55, %v290_v53  ;;  %v761_v59 = vpack.c.bf16 %v293_v58, %v292_v57  ;;  %v295_v61 = vld [vmem:[#allocation8 + $0x38] sm:$0xff]  ;;  %v296_v63 = vld [vmem:[#allocation8 + $0x40] sm:$0xff]  ;;  %v297_v2 = vld [vmem:[#allocation8 + $0x48] sm:$0xff] }
  0x68   :  { %739 = vmatprep.subr.bf16.mxu1 %v960_v0  ;;  %v764_v62 = vpack.c.bf16 %v295_v61, %v294_v60  ;;  %v767_v3 = vpack.c.bf16 %v297_v2, %v296_v63  ;;  %v298_v4 = vld [vmem:[#allocation8 + $0x50] sm:$0xff]  ;;  %v299_v5 = vld [vmem:[#allocation8 + $0x58] sm:$0xff]  ;;  %v300_v7 = vld [vmem:[#allocation8 + $0x60] sm:$0xff] }
  0x69   :  { %717 = vmatpush3.bf16.msra.mxu0 %v716_v21  ;;  %v770_v6 = vpack.c.bf16 %v299_v5, %v298_v4  ;;  %v301_v8 = vld [vmem:[#allocation8 + $0x68] sm:$0xff]  ;;  %v494_v10 = vld [vmem:[%s1152_s2] ss:$0 sm:$0xff]  ;;  %v302_v15 = vld [vmem:[#allocation8 + $0x70] sm:$0xff] }
  0x6a   :  { %718 = vmatprep.subr.bf16.mxu0 %v960_v0  ;;  %v773_v9 = vpack.c.bf16 %v301_v8, %v300_v7  ;;  %v303_v16 = vld [vmem:[#allocation8 + $0x78] sm:$0xff]  ;;  %v382_v18 = vld [vmem:[#allocation10] sm:$0xff]  ;;  %v383_v19 = vld [vmem:[#allocation10 + $0x8] sm:$0xff] }
  0x6b   :  { %741 = vmatpush3.bf16.msra.mxu1 %v740_v30  ;;  %v776_v17 = vpack.c.bf16 %v303_v16, %v302_v15  ;;  %v384_v20 = vld [vmem:[#allocation10 + $0x10] sm:$0xff]  ;;  %v779_v21 = vpack.c.bf16 %v383_v19, %v382_v18  ;;  %v385_v22 = vld [vmem:[#allocation10 + $0x18] sm:$0xff]  ;;  %v386_v24 = vld [vmem:[#allocation10 + $0x20] sm:$0xff] }
  0x6c   :  { %742 = vmatprep.subr.bf16.mxu1 %v960_v0  ;;  %v782_v23 = vpack.c.bf16 %v385_v22, %v384_v20  ;;  %v387_v25 = vld [vmem:[#allocation10 + $0x28] sm:$0xff]  ;;  %v390_v29 = vld [vmem:[#allocation10 + $0x40] sm:$0xff]  ;;  %v392_v32 = vld [vmem:[#allocation10 + $0x50] sm:$0xff] }
  0x6d   :  { %720 = vmatpush3.bf16.msra.mxu0 %v719_v27  ;;  %v785_v26 = vpack.c.bf16 %v387_v25, %v386_v24  ;;  %v389_v27 = vld [vmem:[#allocation10 + $0x38] sm:$0xff]  ;;  %v391_v30 = vld [vmem:[#allocation10 + $0x48] sm:$0xff]  ;;  %v394_v35 = vld [vmem:[#allocation10 + $0x60] sm:$0xff] }
  0x6e   :  { %721 = vmatprep.subr.bf16.mxu0 %v960_v0  ;;  %v791_v31 = vpack.c.bf16 %v391_v30, %v390_v29  ;;  %v495_v38 = vld [vmem:[%s1154_s4] ss:$0 sm:$0xff]  ;;  %v396_v43 = vld [vmem:[#allocation10 + $0x70] sm:$0xff] }
  0x6f   :  { %744 = vmatpush3.bf16.msra.mxu1 %v743_v36  ;;  %v395_v36 = vld [vmem:[#allocation10 + $0x68] sm:$0xff]  ;;  %v397_v44 = vld [vmem:[#allocation10 + $0x78] sm:$0xff] }
  0x70   :  { %745 = vmatprep.subr.bf16.mxu1 %v960_v0  ;;  %v797_v37 = vpack.c.bf16 %v395_v36, %v394_v35 }
  0x71   :  { %723 = vmatpush3.bf16.msra.mxu0 %v722_v33  ;;  %v393_v33 = vld [vmem:[#allocation10 + $0x58] sm:$0xff] }
  0x72   :  { %724 = vmatprep.subr.bf16.mxu0 %v960_v0  ;;  %v794_v34 = vpack.c.bf16 %v393_v33, %v392_v32 }
  0x73   :  { %747 = vmatpush3.bf16.msra.mxu1 %v746_v42 }
  0x74   :  { %748 = vmatprep.subr.bf16.mxu1 %v960_v0 }
  0x75   :  { %726 = vmatpush3.bf16.msra.mxu0 %v725_v39 }
  0x76   :  { %727 = vmatprep.subr.bf16.mxu0 %v960_v0 }
  0x77   :  { %750 = vmatpush3.bf16.msra.mxu1 %v749_v46  ;;  %v496_v46 = vld [vmem:[%s1156_s6] ss:$0 sm:$0xff] }
  0x78   :  { %751 = vmatprep.subr.bf16.mxu1 %v960_v0 }
  0x79   :  { %729 = vmatpush3.bf16.msra.mxu0 %v728_v45  ;;  %v800_v45 = vpack.c.bf16 %v397_v44, %v396_v43 }
  0x7a   :  { %754 = vmatprep.subr.bf16.mxu0 %v960_v0 }
  0x7b   :  { %753 = vmatpush3.bf16.msra.mxu1 %v752_v50  ;;  %v497_v50 = vld [vmem:[%s1158_s8] ss:$0 sm:$0xff] }
  0x7c   :  { %599 = vmatmul.mubr.f32.vlgmr.msra.gmra.mrb[0].mxu0 %v99_v47  ;;  %778 = vmatprep.subr.bf16.mxu1 %v960_v0 }
  0x7d   :  { %668 = vmatprep.mubr.msk.f32.mxu0 %vm961_vm0, %v962_v1  ;;  %756 = vmatpush3.bf16.msra.mxu0 %v755_v54 }
  0x7e   :  { %757 = vmatprep.subr.bf16.mxu0 %v960_v0 }
  0x81   :  { %759 = vmatpush3.bf16.msra.mxu0 %v758_v56 }
  0x82   :  { %760 = vmatprep.subr.bf16.mxu0 %v960_v0 }
  0x85   :  { %762 = vmatpush3.bf16.msra.mxu0 %v761_v59 }
  0x86   :  { %763 = vmatprep.subr.bf16.mxu0 %v960_v0 }
  0x89   :  { %765 = vmatpush3.bf16.msra.mxu0 %v764_v62 }
  0x8a   :  { %766 = vmatprep.subr.bf16.mxu0 %v960_v0 }
  0x8d   :  { %768 = vmatpush3.bf16.msra.mxu0 %v767_v3 }
  0x8e   :  { %769 = vmatprep.subr.bf16.mxu0 %v960_v0 }
  0x91   :  { %771 = vmatpush3.bf16.msra.mxu0 %v770_v6 }
  0x92   :  { %772 = vmatprep.subr.bf16.mxu0 %v960_v0 }
  0x95   :  { %774 = vmatpush3.bf16.msra.mxu0 %v773_v9 }
  0x96   :  { %775 = vmatprep.subr.bf16.mxu0 %v960_v0 }
  0x99   :  { %777 = vmatpush3.bf16.msra.mxu0 %v776_v17 }
 0x14f   :  { %v189_v11 = vpop.f32.mrb[0].mxu0 }
 0x150   :  { %v190_v12 = vadd.f32 %v494_v10, %v189_v11  ;;  %v600_v13 = vpop.f32.mrb[1].mxu0 }
 0x152   :  { %v193_v14 = vmax.f32 %v190_v12, 0.0 }
 0x154   :  { %634 = vmatmul.mubr.f32.vlgmr.msra.gmra.mrb[0].mxu1 %v193_v14 }
 0x155   :  { %703 = vmatprep.mubr.msk.f32.mxu1 %vm961_vm0, %v962_v1  ;;  %780 = vmatpush3.bf16.msra.mxu1 %v779_v21  ;;  %v388_v1 = vld [vmem:[#allocation10 + $0x30] sm:$0xff] }
 0x156   :  { %781 = vmatprep.subr.bf16.mxu1 %v960_v0  ;;  %v788_v28 = vpack.c.bf16 %v389_v27, %v388_v1 }
 0x159   :  { %783 = vmatpush3.bf16.msra.mxu1 %v782_v23 }
 0x15a   :  { %784 = vmatprep.subr.bf16.mxu1 %v960_v0 }
 0x15d   :  { %786 = vmatpush3.bf16.msra.mxu1 %v785_v26 }
 0x15e   :  { %787 = vmatprep.subr.bf16.mxu1 %v960_v0 }
 0x161   :  { %789 = vmatpush3.bf16.msra.mxu1 %v788_v28 }
 0x162   :  { %790 = vmatprep.subr.bf16.mxu1 %v960_v0 }
 0x165   :  { %792 = vmatpush3.bf16.msra.mxu1 %v791_v31 }
 0x166   :  { %793 = vmatprep.subr.bf16.mxu1 %v960_v0 }
 0x169   :  { %795 = vmatpush3.bf16.msra.mxu1 %v794_v34 }
 0x16a   :  { %796 = vmatprep.subr.bf16.mxu1 %v960_v0 }
 0x16d   :  { %798 = vmatpush3.bf16.msra.mxu1 %v797_v37 }
 0x16e   :  { %799 = vmatprep.subr.bf16.mxu1 %v960_v0 }
 0x171   :  { %801 = vmatpush3.bf16.msra.mxu1 %v800_v45 }
 0x227   :  { %v283_v39 = vpop.f32.mrb[0].mxu1 }
 0x228   :  { %v284_v40 = vadd.f32 %v495_v38, %v283_v39  ;;  %v635_v41 = vpop.f32.mrb[1].mxu1 }
 0x22a   :  { %v287_v42 = vmax.f32 %v284_v40, 0.0 }
 0x22c   :  { %669 = vmatmul.mubr.f32.vlgmr.msra.gmra.mrb[2].mxu0 %v287_v42 }
 0x2ff   :  { %v377_v47 = vpop.f32.mrb[2].mxu0 }
 0x300   :  { %v378_v48 = vadd.f32 %v496_v46, %v377_v47  ;;  %v670_v0 = vpop.f32.mrb[3].mxu0 }
 0x302   :  { %v381_v49 = vmax.f32 %v378_v48, 0.0 }
 0x304   :  { %704 = vmatmul.mubr.f32.vlgmr.msra.gmra.mrb[2].mxu1 %v381_v49 }
 0x3d7   :  { %v471_v51 = vpop.f32.mrb[2].mxu1 }
 0x3d8   :  { %v472_v52 = vadd.f32 %v497_v50, %v471_v51  ;;  %v705_v53 = vpop.f32.mrb[3].mxu1 }
 0x3da   :  { %v475_v54 = vmax.f32 %v472_v52, 0.0 }
 0x3dc   :  { %476 = vst [vmem:[#allocation11] sm:$0xff] %v475_v54 }
 0x3dd   :  { %934 = shalt.err (!%p931_p2)
}
 0x3de   :  { %s935_s10 = scalar_lea.hbm %s1159_s9, 128 }
 0x3df   :  { %p936_p3 = scmp.ne.s32.totalorder %s1159_s9, %s935_s10  ;;  %p939_p4 = scmp.lt.u32.totalorder %s935_s10, %s1159_s9 }
 0x3e1   :  { %p941_p5 = pnand %p939_p4, %p936_p3 }
 0x3e3   :  { %944 = shalt.err (!%p941_p5)
}
 0x3e4   :  { %486 = dma.vmem_to_hbm [thread:$0]  %s484_s12, 128, %s1159_s9, [#allocation4]  }
 0x3e5   :  { %951 = dma.done.wait [#allocation4], 128  }
 0x3e6   :  { %952 = vsyncadd [#allocation4], 4294967168 }
 0x3e7   :  { %490 = vsyncpa [#allocation3], 1 }
 0x3e8   :  { %491 = vsyncpa [#allocation6], 1 }
 0x3e9   :  { %492 = vsyncpa [#allocation9], 1 }
 0x3ea   :  { %493 = vsyncpa [#allocation4], 1 }

</bundles_post_ra>
